<compile_context>
chip_gen: v5e
topology: v5e:2x2
jax: 0.10.0
libtpu: 0.0.40
codegen_flags: <defaults>
</compile_context>

<pallas_src>
import functools

import jax
import jax.numpy as jnp
from jax.experimental import pallas as pl
from jax.experimental.pallas import tpu as pltpu

LOG_STD_MAX = 2.0
LOG_STD_MIN = -5.0

HID1 = 256
HID2 = 128
HEAD_PAD = 128          # lane-dense fused head width (one full vreg lane span)
HALF = HEAD_PAD // 2    # log_std columns start here


def _round_up(x, m):
    return ((x + m - 1) // m) * m


def _choose_tile_b(b_padded, tile_b):
    """Batch tile: multiple of 16, capped at tile_b, >=2 tiles for large batches."""
    tb = max(16, _round_up(min(tile_b, b_padded), 16))
    if b_padded <= 64:
        return tb
    n_tiles = max(2, pl.cdiv(b_padded, tb))        # >=2 so both v7x TCs get work
    return min(tb, _round_up(pl.cdiv(b_padded, n_tiles), 16))


# --------------------------------------------------------------------------- #
# Kernel
# --------------------------------------------------------------------------- #
def policy_kernel(x_ref, w1_ref, b1_ref, w2_ref, b2_ref, wh_ref, bh_ref, out_ref):
    # x arrives f32; cast to bf16 in-kernel (VPU) so no separate host convert pass.
    x = x_ref[...].astype(jnp.bfloat16)                                # (tb, D)

    # fc1 + relu   (bf16 MXU inputs, f32 accumulate / epilogue)
    h1 = jnp.dot(x, w1_ref[...], preferred_element_type=jnp.float32) + b1_ref[...]
    h1 = jnp.maximum(h1, 0.0).astype(jnp.bfloat16)                     # (tb, 256)

    # fc2 + relu
    h2 = jnp.dot(h1, w2_ref[...], preferred_element_type=jnp.float32) + b2_ref[...]
    h2 = jnp.maximum(h2, 0.0).astype(jnp.bfloat16)                     # (tb, 128)

    # fused heads: lanes [0,A) = mean, lanes [64,64+A) = log_std pre-activation
    z = jnp.dot(h2, wh_ref[...], preferred_element_type=jnp.float32) + bh_ref[...]

    # tanh squash + affine, folded:  LOG_STD_MIN + 0.5*(MAX-MIN)*(t+1) == 3.5*t - 1.5
    # (tanh over all 128 lanes is EUP filler under MXU/DMA slack -- left as is.)
    squashed = 3.5 * jnp.tanh(z) - 1.5
    lane = jax.lax.broadcasted_iota(jnp.int32, z.shape, 1)
    out_ref[...] = jnp.where(lane >= HALF, squashed, z).astype(out_ref.dtype)


# --------------------------------------------------------------------------- #
# Wrapper
# --------------------------------------------------------------------------- #
def pack_params(p, action_dim):
    """Cast to bf16 once and pack the two heads into one lane-dense (HID2, 128) weight."""
    A = action_dim
    assert A <= HALF, "action_dim must be <= 64 to fit the packed head layout"
    wh = jnp.zeros((HID2, HEAD_PAD), jnp.float32)
    wh = wh.at[:, :A].set(p["wm"])
    wh = wh.at[:, HALF:HALF + A].set(p["wl"])
    bh = jnp.zeros((1, HEAD_PAD), jnp.float32)
    bh = bh.at[:, :A].set(p["bm"])
    bh = bh.at[:, HALF:HALF + A].set(p["bl"])
    return dict(
        w1=p["w1"].astype(jnp.bfloat16), b1=p["b1"].astype(jnp.float32),
        w2=p["w2"].astype(jnp.bfloat16), b2=p["b2"].astype(jnp.float32),
        wh=wh.astype(jnp.bfloat16), bh=bh,
    )


@functools.partial(jax.jit, static_argnames=("action_dim", "tile_b", "out_dtype"))
def policy_forward(x, packed, *, action_dim, tile_b=1024, out_dtype=jnp.float32):
    """x: (B, D_in) float32. packed: output of pack_params. Returns (mean, log_std).

    action_dim is a STATIC python int (needed for the output slices).
    out_dtype=jnp.bfloat16 halves slab writeback (useful on v5e/v6e at large B).
    """
    B, D = x.shape
    A = action_dim

    # Pad B only to the bf16 sublane multiple (16); no-op for typical batch sizes.
    Bp = _round_up(B, 16)
    if Bp != B:
        x = jnp.pad(x, ((0, Bp - B), (0, 0)))

    tb = _choose_tile_b(Bp, tile_b)
    n_tiles = pl.cdiv(Bp, tb)
    grid = (n_tiles,)
    rows_eff = n_tiles * tb    # rows actually processed (last tile may be partial)

    flops = 2 * rows_eff * (D * HID1 + HID1 * HID2 + HID2 * HEAD_PAD)
    out_bytes = 2 if out_dtype == jnp.bfloat16 else 4
    bytes_accessed = (
        rows_eff * D * 4 + Bp * HEAD_PAD * out_bytes                 # x in, slab out
        + (D * HID1 + HID1 * HID2 + HID2 * HEAD_PAD) * 2             # bf16 weights
        + (HID1 + HID2 + HEAD_PAD) * 4                               # f32 biases
    )

    out = pl.pallas_call(
        policy_kernel,
        out_shape=jax.ShapeDtypeStruct((Bp, HEAD_PAD), out_dtype),
        grid_spec=pltpu.PrefetchScalarGridSpec(
            num_scalar_prefetch=0,
            grid=grid,
            in_specs=[
                pl.BlockSpec((tb, D), lambda i: (i, 0)),          # x: tiled over batch
                pl.BlockSpec((D, HID1), lambda i: (0, 0)),        # weights: VMEM-resident
                pl.BlockSpec((1, HID1), lambda i: (0, 0)),
                pl.BlockSpec((HID1, HID2), lambda i: (0, 0)),
                pl.BlockSpec((1, HID2), lambda i: (0, 0)),
                pl.BlockSpec((HID2, HEAD_PAD), lambda i: (0, 0)),
                pl.BlockSpec((1, HEAD_PAD), lambda i: (0, 0)),
            ],
            out_specs=pl.BlockSpec((tb, HEAD_PAD), lambda i: (i, 0)),
        ),
        compiler_params=pltpu.CompilerParams(
            dimension_semantics=("parallel",),       # shard batch tiles across TCs
            vmem_limit_bytes=32 * 1024 * 1024,       # far above actual footprint (<3 MiB)
        ),
        cost_estimate=pl.CostEstimate(
            flops=flops,
            transcendentals=rows_eff * HEAD_PAD,
            bytes_accessed=bytes_accessed,
        ),
    )(x, packed["w1"], packed["b1"], packed["w2"], packed["b2"],
      packed["wh"], packed["bh"])

    # Static slices (A, HALF are python ints) -- cheap, fused by XLA.
    mean = out[:B, :A]
    log_std = out[:B, HALF:HALF + A]
    return mean, log_std


# --------------------------------------------------------------------------- #
# Init + pure-JAX reference
# --------------------------------------------------------------------------- #
def xavier_uniform(key, fan_in, fan_out, gain=1.0):
    limit = gain * jnp.sqrt(6.0 / (fan_in + fan_out))
    return jax.random.uniform(key, (fan_in, fan_out), jnp.float32, -limit, limit)


def init_params(key, input_shape, output_shape):
    k1, k2, k3, k4 = jax.random.split(key, 4)
    # weights xavier-uniform, biases zeros (matches layer_init defaults)
    return dict(
        w1=xavier_uniform(k1, input_shape, HID1), b1=jnp.zeros((1, HID1), jnp.float32),
        w2=xavier_uniform(k2, HID1, HID2),        b2=jnp.zeros((1, HID2), jnp.float32),
        wm=xavier_uniform(k3, HID2, output_shape), bm=jnp.zeros((1, output_shape), jnp.float32),
        wl=xavier_uniform(k4, HID2, output_shape), bl=jnp.zeros((1, output_shape), jnp.float32),
    )


def policy_forward_ref(x, p):
    h1 = jnp.maximum(x @ p["w1"] + p["b1"], 0.0)
    h2 = jnp.maximum(h1 @ p["w2"] + p["b2"], 0.0)
    mean = h2 @ p["wm"] + p["bm"]
    ls = jnp.tanh(h2 @ p["wl"] + p["bl"])
    ls = LOG_STD_MIN + 0.5 * (LOG_STD_MAX - LOG_STD_MIN) * (ls + 1.0)
    return mean, ls


# TODO(synk): get_action (Normal rsample / log_prob / tanh-squash correction) is
# distribution logic outside forward(); left to plain JAX if needed.

if __name__ == "__main__":
    key = jax.random.PRNGKey(0)
    k_param, k_x, k_x2 = jax.random.split(key, 3)

    batch = 2
    input_shape = 16    # observation dim
    output_shape = 4    # action dim

    params = init_params(k_param, input_shape, output_shape)
    packed = pack_params(params, output_shape)

    # small-shape run (B=2 -> padded to one 16-row tile)
    x = jax.random.normal(k_x, (batch, input_shape), jnp.float32)
    mean, log_std = policy_forward(x, packed, action_dim=output_shape)
    jax.block_until_ready((mean, log_std))

    mean_ref, log_std_ref = policy_forward_ref(x, params)
    assert mean.shape == (batch, output_shape)
    assert log_std.shape == (batch, output_shape)
    assert jnp.allclose(mean, mean_ref, atol=3e-2, rtol=3e-2)
    assert jnp.allclose(log_std, log_std_ref, atol=3e-2, rtol=3e-2)
    assert bool(jnp.all(log_std >= LOG_STD_MIN)) and bool(jnp.all(log_std <= LOG_STD_MAX))

    # exercise multi-tile grid + batch-padding path (B=20, tile_b=16 -> grid of 2)
    x2 = jax.random.normal(k_x2, (20, input_shape), jnp.float32)
    mean2, log_std2 = policy_forward(x2, packed, action_dim=output_shape, tile_b=16)
    jax.block_until_ready((mean2, log_std2))
    mean2_ref, log_std2_ref = policy_forward_ref(x2, params)
    assert jnp.allclose(mean2, mean2_ref, atol=3e-2, rtol=3e-2)
    assert jnp.allclose(log_std2, log_std2_ref, atol=3e-2, rtol=3e-2)

    print("KERNEL_OK")
</pallas_src>

<mosaic_0001>
module attributes {stable_mosaic.version = 11 : i64} {
  func.func @policy_kernel(%arg0: i32, %arg1: memref<16x16xf32, #tpu.memory_space<vmem>>, %arg2: memref<16x256xbf16, #tpu.memory_space<vmem>>, %arg3: memref<1x256xf32, #tpu.memory_space<vmem>>, %arg4: memref<256x128xbf16, #tpu.memory_space<vmem>>, %arg5: memref<1x128xf32, #tpu.memory_space<vmem>>, %arg6: memref<128x128xbf16, #tpu.memory_space<vmem>>, %arg7: memref<1x128xf32, #tpu.memory_space<vmem>>, %arg8: memref<16x128xf32, #tpu.memory_space<vmem>>) attributes {dimension_semantics = [#tpu.dimension_semantics<parallel>], iteration_bounds = array<i64: 1>, scalar_prefetch = 0 : i64, scratch_operands = 0 : i64, tpu.core_type = #tpu.core_type<tc>, window_params = [{transform_indices = @transform_0, window_bounds = array<i64: 16, 16>}, {pipeline_mode = #tpu.pipeline_mode<synchronous>, transform_indices = @transform_1, window_bounds = array<i64: 16, 256>}, {pipeline_mode = #tpu.pipeline_mode<synchronous>, transform_indices = @transform_2, window_bounds = array<i64: 1, 256>}, {pipeline_mode = #tpu.pipeline_mode<synchronous>, transform_indices = @transform_3, window_bounds = array<i64: 256, 128>}, {pipeline_mode = #tpu.pipeline_mode<synchronous>, transform_indices = @transform_4, window_bounds = array<i64: 1, 128>}, {pipeline_mode = #tpu.pipeline_mode<synchronous>, transform_indices = @transform_5, window_bounds = array<i64: 128, 128>}, {pipeline_mode = #tpu.pipeline_mode<synchronous>, transform_indices = @transform_6, window_bounds = array<i64: 1, 128>}, {transform_indices = @transform_7, window_bounds = array<i64: 16, 128>}]} {
    %c0 = arith.constant 0 : index
    %c0_0 = arith.constant 0 : index
    %0 = vector.load %arg1[%c0, %c0_0] : memref<16x16xf32, #tpu.memory_space<vmem>>, vector<16x16xf32>
    %1 = arith.truncf %0 : vector<16x16xf32> to vector<16x16xbf16>
    %c0_1 = arith.constant 0 : index
    %c0_2 = arith.constant 0 : index
    %2 = vector.load %arg2[%c0_1, %c0_2] : memref<16x256xbf16, #tpu.memory_space<vmem>>, vector<16x256xbf16>
    %cst = arith.constant dense<0.000000e+00> : vector<16x256xf32>
    %3 = tpu.matmul %1, %2, %cst {dimension_numbers = #tpu.dot_dimension_numbers<[1], [0], [0], [1], [0, 0, 1, 1], [], []>} : vector<16x16xbf16>, vector<16x256xbf16>, vector<16x256xf32> -> vector<16x256xf32>
    %c0_3 = arith.constant 0 : index
    %c0_4 = arith.constant 0 : index
    %4 = vector.load %arg3[%c0_3, %c0_4] : memref<1x256xf32, #tpu.memory_space<vmem>>, vector<1x256xf32>
    %5 = vector.broadcast %4 : vector<1x256xf32> to vector<16x256xf32>
    %6 = arith.addf %3, %5 : vector<16x256xf32>
    %cst_5 = arith.constant 0.000000e+00 : f32
    %7 = vector.broadcast %cst_5 : f32 to vector<16x256xf32>
    %8 = arith.maximumf %6, %7 : vector<16x256xf32>
    %9 = arith.truncf %8 : vector<16x256xf32> to vector<16x256xbf16>
    %c0_6 = arith.constant 0 : index
    %c0_7 = arith.constant 0 : index
    %10 = vector.load %arg4[%c0_6, %c0_7] : memref<256x128xbf16, #tpu.memory_space<vmem>>, vector<256x128xbf16>
    %cst_8 = arith.constant dense<0.000000e+00> : vector<16x128xf32>
    %11 = tpu.matmul %9, %10, %cst_8 {dimension_numbers = #tpu.dot_dimension_numbers<[1], [0], [0], [1], [0, 0, 1, 1], [], []>} : vector<16x256xbf16>, vector<256x128xbf16>, vector<16x128xf32> -> vector<16x128xf32>
    %c0_9 = arith.constant 0 : index
    %c0_10 = arith.constant 0 : index
    %12 = vector.load %arg5[%c0_9, %c0_10] : memref<1x128xf32, #tpu.memory_space<vmem>>, vector<1x128xf32>
    %13 = vector.broadcast %12 : vector<1x128xf32> to vector<16x128xf32>
    %14 = arith.addf %11, %13 : vector<16x128xf32>
    %cst_11 = arith.constant 0.000000e+00 : f32
    %15 = vector.broadcast %cst_11 : f32 to vector<16x128xf32>
    %16 = arith.maximumf %14, %15 : vector<16x128xf32>
    %17 = arith.truncf %16 : vector<16x128xf32> to vector<16x128xbf16>
    %c0_12 = arith.constant 0 : index
    %c0_13 = arith.constant 0 : index
    %18 = vector.load %arg6[%c0_12, %c0_13] : memref<128x128xbf16, #tpu.memory_space<vmem>>, vector<128x128xbf16>
    %cst_14 = arith.constant dense<0.000000e+00> : vector<16x128xf32>
    %19 = tpu.matmul %17, %18, %cst_14 {dimension_numbers = #tpu.dot_dimension_numbers<[1], [0], [0], [1], [0, 0, 1, 1], [], []>} : vector<16x128xbf16>, vector<128x128xbf16>, vector<16x128xf32> -> vector<16x128xf32>
    %c0_15 = arith.constant 0 : index
    %c0_16 = arith.constant 0 : index
    %20 = vector.load %arg7[%c0_15, %c0_16] : memref<1x128xf32, #tpu.memory_space<vmem>>, vector<1x128xf32>
    %21 = vector.broadcast %20 : vector<1x128xf32> to vector<16x128xf32>
    %22 = arith.addf %19, %21 : vector<16x128xf32>
    %23 = math.tanh %22 : vector<16x128xf32>
    %cst_17 = arith.constant 3.500000e+00 : f32
    %24 = vector.broadcast %cst_17 : f32 to vector<16x128xf32>
    %25 = arith.mulf %24, %23 : vector<16x128xf32>
    %cst_18 = arith.constant 1.500000e+00 : f32
    %26 = vector.broadcast %cst_18 : f32 to vector<16x128xf32>
    %27 = arith.subf %25, %26 : vector<16x128xf32>
    %28 = tpu.iota {dimensions = array<i32: 1>} : vector<16x128xi32>
    %c64_i32 = arith.constant 64 : i32
    %29 = vector.broadcast %c64_i32 : i32 to vector<16x128xi32>
    %30 = arith.cmpi sge, %28, %29 : vector<16x128xi32>
    %31 = arith.select %30, %27, %22 : vector<16x128xi1>, vector<16x128xf32>
    %c0_19 = arith.constant 0 : index
    %c0_20 = arith.constant 0 : index
    %32 = vector.load %arg8[%c0_19, %c0_20] : memref<16x128xf32, #tpu.memory_space<vmem>>, vector<16x128xf32>
    tpu.vector_store %arg8[%c0_19, %c0_20], %31 {strides = array<i32>} : memref<16x128xf32, #tpu.memory_space<vmem>>, vector<16x128xf32>,
    return
  }
  func.func @transform_0(%arg0: i32) -> (i32, i32) {
    %c0_i32 = arith.constant 0 : i32
    %c0_i32_0 = arith.constant 0 : i32
    return %arg0, %c0_i32 : i32, i32
  }
  func.func @transform_1(%arg0: i32) -> (i32, i32) {
    %c0_i32 = arith.constant 0 : i32
    %c0_i32_0 = arith.constant 0 : i32
    %c0_i32_1 = arith.constant 0 : i32
    return %c0_i32, %c0_i32_0 : i32, i32
  }
  func.func @transform_2(%arg0: i32) -> (i32, i32) {
    %c0_i32 = arith.constant 0 : i32
    %c0_i32_0 = arith.constant 0 : i32
    %c0_i32_1 = arith.constant 0 : i32
    return %c0_i32, %c0_i32_0 : i32, i32
  }
  func.func @transform_3(%arg0: i32) -> (i32, i32) {
    %c0_i32 = arith.constant 0 : i32
    %c0_i32_0 = arith.constant 0 : i32
    %c0_i32_1 = arith.constant 0 : i32
    return %c0_i32, %c0_i32_0 : i32, i32
  }
  func.func @transform_4(%arg0: i32) -> (i32, i32) {
    %c0_i32 = arith.constant 0 : i32
    %c0_i32_0 = arith.constant 0 : i32
    %c0_i32_1 = arith.constant 0 : i32
    return %c0_i32, %c0_i32_0 : i32, i32
  }
  func.func @transform_5(%arg0: i32) -> (i32, i32) {
    %c0_i32 = arith.constant 0 : i32
    %c0_i32_0 = arith.constant 0 : i32
    %c0_i32_1 = arith.constant 0 : i32
    return %c0_i32, %c0_i32_0 : i32, i32
  }
  func.func @transform_6(%arg0: i32) -> (i32, i32) {
    %c0_i32 = arith.constant 0 : i32
    %c0_i32_0 = arith.constant 0 : i32
    %c0_i32_1 = arith.constant 0 : i32
    return %c0_i32, %c0_i32_0 : i32, i32
  }
  func.func @transform_7(%arg0: i32) -> (i32, i32) {
    %c0_i32 = arith.constant 0 : i32
    %c0_i32_0 = arith.constant 0 : i32
    return %arg0, %c0_i32 : i32, i32
  }
}

</mosaic_0001>

<bundles_post_ra>
// kernel: policy_forward.1
= control target key start
LH: loop header
LB: loop body
LE: loop exit
PB: predicated region body
PF: predicated region fallthrough
CT: control target
= control target key end

     0   :  { %12 = vsyncpa [#allocation3], 0  ;;  %s661_s0 = inlined_call_operand.vmem [shape: f32[16,16], index: 0, kind: input, shape index: {}]   ;;  %s662_s1 = inlined_call_operand.vmem [shape: bf16[16,256], index: 1, kind: input, shape index: {}]   ;;  %s663_s2 = inlined_call_operand.vmem [shape: f32[1,256], index: 2, kind: input, shape index: {}]   ;;  %s664_s3 = inlined_call_operand.hbm [shape: bf16[256,128], index: 3, kind: input, shape index: {}]   ;;  %s665_s4 = inlined_call_operand.vmem [shape: f32[1,128], index: 4, kind: input, shape index: {}]   ;;  %s666_s5 = inlined_call_operand.hbm [shape: bf16[128,128], index: 5, kind: input, shape index: {}]   ;;  %s667_s6 = inlined_call_operand.vmem [shape: f32[1,128], index: 6, kind: input, shape index: {}]   ;;  %s668_s7 = inlined_call_operand.vmem [shape: f32[16,128], index: 7, kind: output, shape index: {}]  }
   0x1   :  { %s24_s26 = sshll.u32 %s664_s3, 4  ;;  %s25_s26 = int_to_ptr.hbm [resolvable:$true] %s24_s26 }
   0x2   :  { %13 = vsyncpa [#allocation5], 0  ;;  %s578_s27 = smov [#allocation2]   ;;  %s39_s8 = sshll.u32 %s666_s5, 4  ;;  %s40_s8 = int_to_ptr.hbm [resolvable:$true] %s39_s8 }
   0x3   :  { %s26_s28 = sshll.u32 %s578_s27, 4  ;;  %s579_s9 = smov 64   ;;  %s27_s28 = int_to_ptr.vmem [resolvable:$true] %s26_s28 }
   0x4   :  { %s580_s10 = smov 4   ;;  %s581_s11 = smov [#allocation4]  }
   0x5   :  { %32 = dma.hbm_to_vmem [thread:$0]  %s25_s26, 2048, %s27_s28, [#allocation3], %s579_s9, %s579_s9, %s580_s10  }
   0x6   :  { %s41_s12 = sshll.u32 %s581_s11, 4  ;;  %s42_s12 = int_to_ptr.vmem [resolvable:$true] %s41_s12 }
   0x7   :  { %47 = dma.hbm_to_vmem [thread:$0]  %s40_s8, 1024, %s42_s12, [#allocation5], %s579_s9, %s579_s9, %s580_s10  }
   0x8   :  { %574 = dma.done.wait [#allocation3], 2048  }
   0x9   :  { %575 = vsyncadd [#allocation3], 4294965248 }
   0xa   :  { %576 = dma.done.wait [#allocation5], 1024  }
   0xb   :  { %577 = vsyncadd [#allocation5], 4294966272  ;;  %v384_v0 = vld [vmem:[%s662_s1] sm:$0xf]  ;;  %v491_v1 = vld [vmem:[%s662_s1 + $0x4] sm:$0xf0] }
   0xc   :  { %v59_v2 = vld [vmem:[%s661_s0] sm:$0xff]  ;;  %v385_v3 = vor.u32 %v491_v1, %v384_v0  ;;  %v60_v4 = vld [vmem:[%s661_s0 + $0x8] sm:$0xff]  ;;  %v499_v9 = vld [vmem:[#allocation2 + $0x38] sm:$0xff]  ;;  %vm80_vm0 = vcmask 130048   ;;  %v369_v1 = vlaneseq }
   0xd   :  { %v490_v5 = vld [vmem:[%s662_s1 + $0x4] sm:$0xf]  ;;  %v386_v6 = vld [vmem:[%s662_s1 + $0x8] sm:$0xf0]  ;;  %v61_v7 = vpack.c.bf16 %v60_v4, %v59_v2  ;;  %250 = vmatpush.bf16.msra.mxu2 %v499_v9  ;;  %v498_v10 = vld [vmem:[#allocation2 + $0x30] sm:$0xff] }
   0xe   :  { %v389_v8 = vor.u32 %v490_v5, %v386_v6  ;;  %91 = vmatpush.bf16.msra.mxu1 %v385_v3  ;;  %v497_v11 = vld [vmem:[#allocation2 + $0x28] sm:$0xff]  ;;  %v496_v12 = vld [vmem:[#allocation2 + $0x20] sm:$0xff]  ;;  %v495_v13 = vld [vmem:[#allocation2 + $0x18] sm:$0xff]  ;;  %v370_v2 = vand.u32 127, %v369_v1 }
   0xf   :  { %v507_v14 = vld [vmem:[#allocation2 + $0x78] sm:$0xff]  ;;  %v494_v15 = vld [vmem:[#allocation2 + $0x10] sm:$0xff]  ;;  %v493_v17 = vld [vmem:[#allocation2 + $0x8] sm:$0xff] }
  0x10   :  { %264 = vmatpush.bf16.msra.mxu3 %v507_v14  ;;  %v506_v16 = vld [vmem:[#allocation2 + $0x70] sm:$0xff]  ;;  %v505_v18 = vld [vmem:[#allocation2 + $0x68] sm:$0xff]  ;;  %v492_v19 = vld [vmem:[#allocation2] sm:$0xff]  ;;  %vm371_vm1 = vcmp.ge.s32.totalorder %v370_v2, 64 }
  0x11   :  { %390 = vmatmul.msk.bf16.vlgmr.msra.gmra.mxu1 %vm80_vm0, %v61_v7  ;;  %251 = vmatpush.bf16.msra.mxu2 %v498_v10  ;;  %v504_v20 = vld [vmem:[#allocation2 + $0x60] sm:$0xff]  ;;  %v503_v21 = vld [vmem:[#allocation2 + $0x58] sm:$0xff]  ;;  %v502_v22 = vld [vmem:[#allocation2 + $0x50] sm:$0xff] }
  0x12   :  { %105 = vmatpush.bf16.msrb.mxu1 %v389_v8  ;;  %v501_v23 = vld [vmem:[#allocation2 + $0x48] sm:$0xff]  ;;  %v500_v24 = vld [vmem:[#allocation2 + $0x40] sm:$0xff]  ;;  %v515_v42 = vld [vmem:[#allocation4 + $0x38] sm:$0xff] }
  0x13   :  { %v64_v25 = vld [vmem:[%s663_s2] sm:$0x3]  ;;  %349 = vmatpush.bf16.msra.mxu0 %v515_v42  ;;  %v514_v43 = vld [vmem:[#allocation4 + $0x30] sm:$0xff]  ;;  %v513_v44 = vld [vmem:[#allocation4 + $0x28] sm:$0xff] }
  0x14   :  { %265 = vmatpush.bf16.msra.mxu3 %v506_v16  ;;  %v66_v27 = vperm.slane %v64_v25, 0  ;;  %v67_v35 = vperm.slane %v64_v25, 1  ;;  %v512_v45 = vld [vmem:[#allocation4 + $0x20] sm:$0xff]  ;;  %v511_v46 = vld [vmem:[#allocation4 + $0x18] sm:$0xff]  ;;  %v510_v47 = vld [vmem:[#allocation4 + $0x10] sm:$0xff] }
  0x15   :  { %252 = vmatpush.bf16.msra.mxu2 %v497_v11  ;;  %v509_v48 = vld [vmem:[#allocation4 + $0x8] sm:$0xff]  ;;  %v508_v49 = vld [vmem:[#allocation4] sm:$0xff] }
  0x16   :  { %v520_v52 = vld [vmem:[%s665_s4] ss:$0 sm:$0xff] }
  0x17   :  { %350 = vmatpush.bf16.msra.mxu0 %v514_v43  ;;  %v521_v62 = vld [vmem:[%s667_s6] ss:$0 sm:$0xff] }
  0x18   :  { %266 = vmatpush.bf16.msra.mxu3 %v505_v18 }
  0x19   :  { %253 = vmatpush.bf16.msra.mxu2 %v496_v12 }
  0x1b   :  { %351 = vmatpush.bf16.msra.mxu0 %v513_v44 }
  0x1c   :  { %267 = vmatpush.bf16.msra.mxu3 %v504_v20 }
  0x1d   :  { %254 = vmatpush.bf16.msra.mxu2 %v495_v13 }
  0x1f   :  { %352 = vmatpush.bf16.msra.mxu0 %v512_v45 }
  0x20   :  { %268 = vmatpush.bf16.msra.mxu3 %v503_v21 }
  0x21   :  { %391 = vmatmul.msk.bf16.vlgmr.msrb.gmra.mxu1 %vm80_vm0, %v61_v7  ;;  %255 = vmatpush.bf16.msra.mxu2 %v494_v15 }
  0x23   :  { %353 = vmatpush.bf16.msra.mxu0 %v511_v46 }
  0x24   :  { %269 = vmatpush.bf16.msra.mxu3 %v502_v22 }
  0x25   :  { %256 = vmatpush.bf16.msra.mxu2 %v493_v17 }
  0x27   :  { %354 = vmatpush.bf16.msra.mxu0 %v510_v47 }
  0x28   :  { %270 = vmatpush.bf16.msra.mxu3 %v501_v23 }
  0x29   :  { %257 = vmatpush.bf16.msra.mxu2 %v492_v19 }
  0x2b   :  { %355 = vmatpush.bf16.msra.mxu0 %v509_v48 }
  0x2c   :  { %271 = vmatpush.bf16.msra.mxu3 %v500_v24 }
  0x2f   :  { %356 = vmatpush.bf16.msra.mxu0 %v508_v49 }
  0x8e   :  { %v93_v26 = vpop.f32.mrf.mxu1 }
  0x8f   :  { %v94_v28 = vadd.f32 %v93_v26, %v66_v27 }
  0x91   :  { %v112_v31 = vmax.f32 %v94_v28, 0.0 }
  0x96   :  { %v95_v29 = vpop.f32.mrf.mxu1 }
  0x97   :  { %v96_v30 = vadd.f32 %v95_v29, %v66_v27 }
  0x99   :  { %v114_v32 = vmax.f32 %v96_v30, 0.0 }
  0x9b   :  { %v116_v33 = vpack.c.bf16 %v114_v32, %v112_v31 }
  0x9d   :  { %258 = vmatmul.bf16.vlgmr.msra.gmra.mxu2 %v116_v33 }
  0x9e   :  { %v107_v34 = vpop.f32.mrf.mxu1 }
  0x9f   :  { %v108_v36 = vadd.f32 %v107_v34, %v67_v35 }
  0xa1   :  { %v113_v39 = vmax.f32 %v108_v36, 0.0 }
  0xa6   :  { %v109_v37 = vpop.f32.mrf.mxu1 }
  0xa7   :  { %v110_v38 = vadd.f32 %v109_v37, %v67_v35 }
  0xa9   :  { %v115_v40 = vmax.f32 %v110_v38, 0.0 }
  0xab   :  { %v117_v41 = vpack.c.bf16 %v115_v40, %v113_v39 }
  0xad   :  { %272 = vmatmul.bf16.vlgmr.msra.gmra.mxu3 %v117_v41 }
 0x120   :  { %v259_v50 = vpop.f32.mrf.mxu2 }
 0x121   :  { %v260_v54 = vadd.f32 %v520_v52, %v259_v50 }
 0x128   :  { %v261_v53 = vpop.f32.mrf.mxu2 }
 0x129   :  { %v262_v55 = vadd.f32 %v520_v52, %v261_v53 }
 0x130   :  { %v273_v51 = vpop.f32.mrf.mxu3 }
 0x131   :  { %v274_v56 = vadd.f32 %v273_v51, %v260_v54 }
 0x133   :  { %v278_v59 = vmax.f32 %v274_v56, 0.0 }
 0x138   :  { %v275_v57 = vpop.f32.mrf.mxu3 }
 0x139   :  { %v276_v58 = vadd.f32 %v275_v57, %v262_v55 }
 0x13b   :  { %v279_v60 = vmax.f32 %v276_v58, 0.0 }
 0x13d   :  { %v280_v61 = vpack.c.bf16 %v279_v60, %v278_v59 }
 0x13f   :  { %357 = vmatmul.bf16.vlgmr.msra.gmra.mxu0 %v280_v61 }
 0x1bc   :  { %v358_v63 = vpop.f32.mrf.mxu0 }
 0x1bd   :  { %v359_v0 = vadd.f32 %v521_v62, %v358_v63 }
 0x1bf   :  { %522 = vtanh.f32 %v359_v0 }
 0x1c4   :  { %v360_v3 = vpop.f32.mrf.mxu0 }
 0x1c5   :  { %v523_v4 = vpop.eup %522  ;;  %v361_v5 = vadd.f32 %v521_v62, %v360_v3 }
 0x1c6   :  { %v365_v6 = vmul.f32 3.5, %v523_v4 }
 0x1c7   :  { %524 = vtanh.f32 %v361_v5 }
 0x1c8   :  { %v488_v7 = vadd.f32 -1.5, %v365_v6 }
 0x1ca   :  { %v372_v8 = vsel %vm371_vm1, %v488_v7, %v359_v0 }
 0x1cb   :  { %374 = vst [vmem:[%s668_s7] sm:$0xff] %v372_v8 }
 0x1cd   :  { %v525_v9 = vpop.eup %524 }
 0x1ce   :  { %v366_v10 = vmul.f32 3.5, %v525_v9 }
 0x1d0   :  { %v489_v11 = vadd.f32 -1.5, %v366_v10 }
 0x1d2   :  { %v373_v12 = vsel %vm371_vm1, %v489_v11, %v361_v5 }
 0x1d3   :  { %375 = vst [vmem:[%s668_s7 + $0x8] sm:$0xff] %v373_v12 }
 0x1d4   :  { %380 = vsyncpa [#allocation3], 1 }
 0x1d5   :  { %381 = vsyncpa [#allocation5], 1 }

</bundles_post_ra>
